<compile_context>
chip_gen: v7x
topology: tpu7x:2x2x1
jax: 0.10.0
libtpu: 0.0.40
codegen_flags: <defaults>
</compile_context>

<pallas_src>
from functools import partial

import jax
import jax.numpy as jnp
from jax.experimental import pallas as pl
from jax.experimental.pallas import tpu as pltpu

LANES = 128
SUBLANES = 8
NUM_CORES = 2  # megacore split factor for v7x; harmless on single-TC chips


def _charbonnier_kernel(x_ref, y_ref, out_ref, *, eps, rows_valid, tr, steps):
    c = pl.program_id(0)
    i = pl.program_id(1)

    # The output block (c, 0) is resident across the whole reduction axis i,
    # so accumulate into it directly; init at the start of this core's loop.
    @pl.when(i == 0)
    def _():
        out_ref[...] = jnp.zeros_like(out_ref)

    xv = x_ref[...].astype(jnp.float32)
    yv = y_ref[...].astype(jnp.float32)
    diff = xv - yv
    err = jnp.sqrt(diff * diff + eps)  # elementwise: VPU (+EUP sqrt), no XLU

    block_id = c * steps + i
    # Only the partial last block and phantom (clamped) blocks contain rows
    # beyond the valid range; interior blocks skip the mask entirely.
    needs_mask = (block_id + 1) * tr > rows_valid

    @pl.when(needs_mask)
    def _():
        # Row-index compare only (no flat element index): max row index is
        # n/128, so no int32 overflow for any tensor that fits in HBM.
        row = block_id * tr + jax.lax.broadcasted_iota(jnp.int32, (tr, LANES), 0)
        # NOTE: `err` may hold NaN/Inf computed from stale VMEM rows past the
        # array edge (partial last block). The select below must stay AFTER the
        # sqrt: the unselected lanes are dropped, so garbage cannot propagate.
        e = jnp.where(row < rows_valid, err, 0.0)
        out_ref[...] += e.reshape(tr // SUBLANES, SUBLANES, LANES).sum(axis=0)

    @pl.when(jnp.logical_not(needs_mask))
    def _():
        # Pure-VPU fold of (tr,128) onto the vreg-shaped (8,128) accumulator.
        out_ref[...] += err.reshape(tr // SUBLANES, SUBLANES, LANES).sum(axis=0)


def charbonnier_loss(x, y, eps=1e-6, row_tile=4096):
    assert x.shape == y.shape, (x.shape, y.shape)
    assert row_tile % SUBLANES == 0
    n = x.size
    if n == 0:
        return jnp.asarray(jnp.nan, x.dtype)  # matches torch.mean of empty

    eps = float(eps)
    xf = jnp.ravel(x)  # bitcast (free) for contiguous inputs
    yf = jnp.ravel(y)

    chunk = SUBLANES * LANES              # 1024
    n_main = (n // chunk) * chunk         # 1024-aligned prefix for the kernel
    tail = n - n_main                     # < 1024 elements, reduced in plain JAX

    tail_sum = None
    if tail:
        xt = xf[n_main:].astype(jnp.float32)
        yt = yf[n_main:].astype(jnp.float32)
        dt = xt - yt
        tail_sum = jnp.sum(jnp.sqrt(dt * dt + eps))

    if n_main:
        if tail:
            # TODO(synk): the prefix slice still costs one ~N-word copy per
            # input when n is misaligned; a fully copy-free path needs 1-D
            # blocks over the unpadded flat array (in-kernel reshape).
            xk, yk = xf[:n_main], yf[:n_main]
        else:
            xk, yk = xf, yf  # copy-free common case

        rows = n_main // LANES            # multiple of 8 by construction
        x2 = xk.reshape(rows, LANES)      # bitcast
        y2 = yk.reshape(rows, LANES)

        tr = min(row_tile, rows)          # multiple of 8
        nblocks = (rows + tr - 1) // tr   # last block may be partial
        steps = (nblocks + NUM_CORES - 1) // NUM_CORES

        if NUM_CORES * steps == nblocks:
            in_map = lambda c, i: (c * steps + i, 0)
        else:
            # Phantom trailing block(s): clamp to the last real block (reads
            # in-bounds data) and let the in-kernel row mask zero them out.
            in_map = lambda c, i: (jnp.minimum(c * steps + i, nblocks - 1), 0)

        in_spec = pl.BlockSpec((tr, LANES), in_map)
        out_spec = pl.BlockSpec((SUBLANES, LANES), lambda c, i: (c, 0))

        kernel = partial(_charbonnier_kernel, eps=eps, rows_valid=rows, tr=tr,
                         steps=steps)

        # 2 inputs x 2 pipeline buffers, plus headroom for internal scratch.
        block_bytes = tr * LANES * x2.dtype.itemsize
        vmem_limit = int(max(16 << 20, min(56 << 20, 4 * block_bytes + (8 << 20))))

        partials = pl.pallas_call(
            kernel,
            out_shape=jax.ShapeDtypeStruct((NUM_CORES * SUBLANES, LANES), jnp.float32),
            grid_spec=pltpu.PrefetchScalarGridSpec(
                num_scalar_prefetch=0,
                grid=(NUM_CORES, steps),
                in_specs=[in_spec, in_spec],
                out_specs=out_spec,
            ),
            compiler_params=pltpu.CompilerParams(
                dimension_semantics=("parallel", "arbitrary"),
                vmem_limit_bytes=vmem_limit,
            ),
        )(x2, y2)

        # Tiny final reduce (2*8*128 f32) in plain JAX.
        total = jnp.sum(partials)
        if tail_sum is not None:
            total = total + tail_sum
    else:
        total = tail_sum  # n < 1024: pure-JAX path

    return (total / n).astype(x.dtype)


def charbonnier_loss_ref(x, y, eps=1e-6):
    diff = x - y
    return jnp.mean(jnp.sqrt(diff * diff + eps))


if __name__ == "__main__":
    key = jax.random.PRNGKey(0)
    kx, ky = jax.random.split(key)
    # NCHW like the PyTorch module; 2048 elements -> fully copy-free kernel path.
    x = jax.random.normal(kx, (2, 4, 16, 16), dtype=jnp.float32)
    y = jax.random.normal(ky, (2, 4, 16, 16), dtype=jnp.float32)

    loss = jax.block_until_ready(charbonnier_loss(x, y))
    ref = charbonnier_loss_ref(x, y)
    assert jnp.allclose(loss, ref, rtol=1e-5, atol=1e-6), (loss, ref)

    # Misaligned-size path: 1024-aligned prefix through the kernel + JAX tail.
    k3, k4 = jax.random.split(ky)
    xm = jax.random.normal(k3, (3, 5, 17, 13), dtype=jnp.float32)  # 3315 elems
    ym = jax.random.normal(k4, (3, 5, 17, 13), dtype=jnp.float32)
    loss_m = jax.block_until_ready(charbonnier_loss(xm, ym))
    ref_m = charbonnier_loss_ref(xm, ym)
    assert jnp.allclose(loss_m, ref_m, rtol=1e-5, atol=1e-6), (loss_m, ref_m)

    print("KERNEL_OK")
</pallas_src>

<mosaic_0001>
module attributes {stable_mosaic.version = 11 : i64} {
  func.func @_charbonnier_kernel(%arg0: i32, %arg1: i32, %arg2: memref<16x128xf32, #tpu.memory_space<vmem>>, %arg3: memref<16x128xf32, #tpu.memory_space<vmem>>, %arg4: memref<8x128xf32, #tpu.memory_space<vmem>>) attributes {dimension_semantics = [#tpu.dimension_semantics<parallel>, #tpu.dimension_semantics<arbitrary>], iteration_bounds = array<i64: 2, 1>, scalar_prefetch = 0 : i64, scratch_operands = 0 : i64, tpu.core_type = #tpu.core_type<tc>, window_params = [{transform_indices = @transform_0, window_bounds = array<i64: 16, 128>}, {transform_indices = @transform_1, window_bounds = array<i64: 16, 128>}, {transform_indices = @transform_2, window_bounds = array<i64: 8, 128>}]} {
    %c0_i32 = arith.constant 0 : i32
    %0 = arith.cmpi eq, %arg1, %c0_i32 : i32
    %1 = arith.extui %0 : i1 to i32
    %c0_i32_0 = arith.constant 0 : i32
    %2 = arith.cmpi ne, %1, %c0_i32_0 : i32
    scf.if %2 {
      %cst_8 = arith.constant 0.000000e+00 : f32
      %20 = vector.broadcast %cst_8 : f32 to vector<8x128xf32>
      %c0_9 = arith.constant 0 : index
      %c0_10 = arith.constant 0 : index
      %21 = vector.load %arg4[%c0_9, %c0_10] : memref<8x128xf32, #tpu.memory_space<vmem>>, vector<8x128xf32>
      tpu.vector_store %arg4[%c0_9, %c0_10], %20 {strides = array<i32>} : memref<8x128xf32, #tpu.memory_space<vmem>>, vector<8x128xf32>,
    } else {
    }
    %c0 = arith.constant 0 : index
    %c0_1 = arith.constant 0 : index
    %3 = vector.load %arg2[%c0, %c0_1] : memref<16x128xf32, #tpu.memory_space<vmem>>, vector<16x128xf32>
    %c0_2 = arith.constant 0 : index
    %c0_3 = arith.constant 0 : index
    %4 = vector.load %arg3[%c0_2, %c0_3] : memref<16x128xf32, #tpu.memory_space<vmem>>, vector<16x128xf32>
    %5 = arith.subf %3, %4 : vector<16x128xf32>
    %6 = arith.mulf %5, %5 : vector<16x128xf32>
    %cst = arith.constant 9.99999997E-7 : f32
    %7 = vector.broadcast %cst : f32 to vector<16x128xf32>
    %8 = arith.addf %6, %7 : vector<16x128xf32>
    %9 = math.sqrt %8 : vector<16x128xf32>
    %c1_i32 = arith.constant 1 : i32
    %10 = arith.muli %arg0, %c1_i32 : i32
    %11 = arith.addi %10, %arg1 : i32
    %c1_i32_4 = arith.constant 1 : i32
    %12 = arith.addi %11, %c1_i32_4 : i32
    %c16_i32 = arith.constant 16 : i32
    %13 = arith.muli %12, %c16_i32 : i32
    %c16_i32_5 = arith.constant 16 : i32
    %14 = arith.cmpi sgt, %13, %c16_i32_5 : i32
    %15 = arith.extui %14 : i1 to i32
    %c0_i32_6 = arith.constant 0 : i32
    %16 = arith.cmpi ne, %15, %c0_i32_6 : i32
    scf.if %16 {
      %c16_i32_8 = arith.constant 16 : i32
      %20 = arith.muli %11, %c16_i32_8 : i32
      %21 = tpu.iota {dimensions = array<i32: 0>} : vector<16x128xi32>
      %22 = vector.broadcast %20 : i32 to vector<16x128xi32>
      %23 = arith.addi %22, %21 : vector<16x128xi32>
      %c16_i32_9 = arith.constant 16 : i32
      %24 = vector.broadcast %c16_i32_9 : i32 to vector<16x128xi32>
      %25 = arith.cmpi slt, %23, %24 : vector<16x128xi32>
      %cst_10 = arith.constant 0.000000e+00 : f32
      %26 = vector.broadcast %cst_10 : f32 to vector<16x128xf32>
      %27 = arith.select %25, %9, %26 : vector<16x128xi1>, vector<16x128xf32>
      %c0_11 = arith.constant 0 : index
      %c0_12 = arith.constant 0 : index
      %28 = vector.load %arg4[%c0_11, %c0_12] : memref<8x128xf32, #tpu.memory_space<vmem>>, vector<8x128xf32>
      %29 = vector.shape_cast %27 : vector<16x128xf32> to vector<2x8x128xf32>
      %cst_13 = arith.constant dense<0.000000e+00> : vector<8x128xf32>
      %30 = vector.multi_reduction <add>, %29, %cst_13 [0] : vector<2x8x128xf32> to vector<8x128xf32>
      %31 = arith.addf %28, %30 : vector<8x128xf32>
      %c0_14 = arith.constant 0 : index
      %c0_15 = arith.constant 0 : index
      %32 = vector.load %arg4[%c0_14, %c0_15] : memref<8x128xf32, #tpu.memory_space<vmem>>, vector<8x128xf32>
      tpu.vector_store %arg4[%c0_14, %c0_15], %31 {strides = array<i32>} : memref<8x128xf32, #tpu.memory_space<vmem>>, vector<8x128xf32>,
    } else {
    }
    %true = arith.constant true
    %17 = arith.xori %14, %true : i1
    %18 = arith.extui %17 : i1 to i32
    %c0_i32_7 = arith.constant 0 : i32
    %19 = arith.cmpi ne, %18, %c0_i32_7 : i32
    scf.if %19 {
      %c0_8 = arith.constant 0 : index
      %c0_9 = arith.constant 0 : index
      %20 = vector.load %arg4[%c0_8, %c0_9] : memref<8x128xf32, #tpu.memory_space<vmem>>, vector<8x128xf32>
      %21 = vector.shape_cast %9 : vector<16x128xf32> to vector<2x8x128xf32>
      %cst_10 = arith.constant dense<0.000000e+00> : vector<8x128xf32>
      %22 = vector.multi_reduction <add>, %21, %cst_10 [0] : vector<2x8x128xf32> to vector<8x128xf32>
      %23 = arith.addf %20, %22 : vector<8x128xf32>
      %c0_11 = arith.constant 0 : index
      %c0_12 = arith.constant 0 : index
      %24 = vector.load %arg4[%c0_11, %c0_12] : memref<8x128xf32, #tpu.memory_space<vmem>>, vector<8x128xf32>
      tpu.vector_store %arg4[%c0_11, %c0_12], %23 {strides = array<i32>} : memref<8x128xf32, #tpu.memory_space<vmem>>, vector<8x128xf32>,
    } else {
    }
    return
  }
  func.func @transform_0(%arg0: i32, %arg1: i32) -> (i32, i32) {
    %c1_i32 = arith.constant 1 : i32
    %0 = arith.muli %arg0, %c1_i32 : i32
    %1 = arith.addi %0, %arg1 : i32
    %c0_i32 = arith.constant 0 : i32
    %2 = arith.minsi %1, %c0_i32 : i32
    %c0_i32_0 = arith.constant 0 : i32
    %c0_i32_1 = arith.constant 0 : i32
    return %2, %c0_i32_0 : i32, i32
  }
  func.func @transform_1(%arg0: i32, %arg1: i32) -> (i32, i32) {
    %c1_i32 = arith.constant 1 : i32
    %0 = arith.muli %arg0, %c1_i32 : i32
    %1 = arith.addi %0, %arg1 : i32
    %c0_i32 = arith.constant 0 : i32
    %2 = arith.minsi %1, %c0_i32 : i32
    %c0_i32_0 = arith.constant 0 : i32
    %c0_i32_1 = arith.constant 0 : i32
    return %2, %c0_i32_0 : i32, i32
  }
  func.func @transform_2(%arg0: i32, %arg1: i32) -> (i32, i32) {
    %c0_i32 = arith.constant 0 : i32
    %c0_i32_0 = arith.constant 0 : i32
    return %arg0, %c0_i32 : i32, i32
  }
}

</mosaic_0001>

<bundles_post_ra>
// kernel: tpu_custom_call.1
= control target key start
LH: loop header
LB: loop body
LE: loop exit
PB: predicated region body
PF: predicated region fallthrough
CT: control target
= control target key end

     0   :  { %7 = vsyncpa [#allocation3], 0  ;;  %s946_s0 = inlined_call_operand.hbm [shape: f32[16,128], index: 0, kind: input, shape index: {}]   ;;  %s947_s1 = inlined_call_operand.hbm [shape: f32[16,128], index: 1, kind: input, shape index: {}]   ;;  %s948_s2 = inlined_call_operand.hbm [shape: f32[16,128], index: 2, kind: output, shape index: {}]  }
   0x1   :  { %9 = vsyncpa [#allocation3 + $0x1], 0 }
   0x2   :  { %10 = vsyncpa [#allocation6], 0 }
   0x3   :  { %12 = vsyncpa [#allocation6 + $0x1], 0 }
   0x4   :  { %13 = vsyncpa [#allocation4], 0 }
   0x5   :  { %15 = vsyncpa [#allocation4 + $0x1], 0  ;;  %s728_s9 = smov 0   ;;  %s730_s10 = smov 0  }
   0x6   :  { %s732_s11 = smov 0   ;;  %s734_s12 = smov 0  }
   0x7   :  { %s736_s13 = smov 0   ;;  %s738_s14 = smov 0  }
   0x8   :  { %s740_s15 = smov 0   ;;  %s742_s16 = smov 0  }
   0x9 LB: > { %s414_s17 = sadd.s32 4294967295, %s705_s16   ;;  %s415_s18 = sadd.s32 4294967294, %s705_s16   ;;  %s705_s16 = sphi %s742_s16, %s21_s16   ;;  %s701_s15 = sphi %s740_s15, %s967_s15   ;;  %s697_s14 = sphi %s738_s14, %s966_s14   ;;  %s693_s13 = sphi %s736_s13, %s936_s13   ;;  %s689_s12 = sphi %s734_s12, %s965_s12   ;;  %s685_s11 = sphi %s732_s11, %s964_s11   ;;  %s681_s10 = sphi %s730_s10, %s963_s10   ;;  %s677_s9 = sphi %s728_s9, %s962_s9  }
   0xa   : > { %s33_s19 = sadd.s32 1, %s701_s15  ;;  %p674_p1 = scmp.ne.s32.totalorder %s693_s13, 0 }
   0xb   : > { %p35_p0 = scmp.ge.s32.totalorder %s33_s19, 2  ;;  %p54_p2 = scmp.eq.s32.totalorder %s705_s16, 0 }
   0xc   : > { %p59_p3 = scmp.ne.s32.totalorder %s693_s13, %s689_s12  ;;  %p60_p5 = scmp.eq.s32.totalorder %s414_s17, 0 }
   0xd   : > { %s969_s19 = smov (%p35_p0, %s33_s19), 0  ;;  %p774_p4 = por %p674_p1, %p54_p2 }
   0xe   : > { %p778_p6 = por %p60_p5, %p59_p3  ;;  %s101_s22 = ssub.s32 %s701_s15, %s969_s19 }
   0xf   : > { %p102_p7 = scmp.eq.s32.totalorder %s101_s22, 0  ;;  %s104_s23 = sadd.s32 1, %s685_s11 }
  0x10   : > { %s952_s21 = scalar_select %p778_p6, 1, 0 }
  0x11   : > { %s786_s24 = scalar_select %p102_p7, %s685_s11, %s104_s23  }
  0x12   : > { %p114_p8 = scmp.ne.s32.totalorder %s685_s11, %s681_s10  ;;  %p115_p9 = scmp.eq.s32.totalorder %s414_s17, 1 }
  0x13   : > { %p120_p10 = scmp.ne.s32.totalorder %s681_s10, %s677_s9  ;;  %p121_p11 = scmp.eq.s32.totalorder %s415_s18, 1 }
  0x14   : > { %p792_p12 = por %p115_p9, %p114_p8  ;;  %p457_p1 = scmp.lt.s32.totalorder %s705_s16, 2 }
  0x15   : > { %p797_p0 = por %p121_p11, %p120_p10  ;;  %s707_s27 = smov [#allocation2]  }
  0x16   : > { %s953_s25 = scalar_select %p792_p12, 1, 0 }
  0x17   : > { %s954_s26 = scalar_select %p797_p0, 1, 0 }
  0x18   : > { %s155_s28 = sshll.u32 %s707_s27, 4  ;;  %p804_p2 = pnand %p457_p1, %p774_p4  ;;  %s156_s28 = int_to_ptr.vmem [resolvable:$true] %s155_s28 }
  0x19   : > { %s538_s4 = scalar_lea.hbm %s946_s0, 256 }
  0x1a   : > { %p539_p3 = scmp.ne.s32.totalorder %s946_s0, %s538_s4  ;;  %p540_p5 = pneg %p804_p2 }
  0x1b   : > { %p545_p8 = scmp.lt.u32.totalorder %s538_s4, %s538_s4  ;;  %p547_p9 = scmp.lt.u32.totalorder %s538_s4, %s946_s0 }
  0x1c   : > { %p541_p7 = pnand %p540_p5, %p539_p3 }
  0x1d   : > { %p548_p10 = por %p547_p9, %p545_p8 }
  0x1e   : > { %p542_p4 = pneg %p541_p7 }
  0x20   : > { %p549_p11 = pnand %p548_p10, %p542_p4 }
  0x22   : > { %552 = shalt.err (!%p549_p11)
}
  0x23   : > { %s553_s12 = scalar_lea.vmem %s156_s28, 256  ;;  %s560_s17 = scalar_lea.vmem %s156_s28, 512 }
  0x24   : > { %p554_p1 = scmp.ne.s32.totalorder %s156_s28, %s553_s12  ;;  %p561_p12 = scmp.lt.s32.totalorder %s156_s28, %s156_s28 }
  0x25   : > { %p562_p6 = scmp.lt.s32.totalorder %s560_s17, %s553_s12 }
  0x26   : > { %p556_p13 = pnand %p554_p1, %p540_p5 }
  0x27   : > { %p563_p3 = por %p562_p6, %p561_p12 }
  0x28   : > { %p557_p0 = pneg %p556_p13 }
  0x2a   : > { %p564_p7 = pnand %p563_p3, %p557_p0 }
  0x2c   : > { %567 = shalt.err (!%p564_p7)
}
  0x2d   : > { %s708_s18 = smov 128   ;;  %s709_s20 = smov 8  }
  0x2e   : > { %449 = dma.hbm_to_vmem [thread:$0]  (!%p804_p2), %s946_s0, 256, %s156_s28, [#allocation3], %s708_s18, %s708_s18, %s709_s20  }
  0x2f   : > { %p424_p13 = scmp.ge.s32.totalorder %s705_s16, 1  ;;  %p187_p4 = scmp.lt.s32.totalorder %s705_s16, 3 }
  0x30   : > { %s710_s30 = smov [#allocation5]   ;;  %s568_s6 = scalar_lea.hbm %s947_s1, 256 }
  0x31   : > { %p835_p8 = pnand %p424_p13, %p187_p4  ;;  %s179_s3 = sshll.u32 %s710_s30, 4  ;;  %s180_s3 = int_to_ptr.vmem [resolvable:$true] %s179_s3 }
  0x32   : > { %p569_p6 = scmp.ne.s32.totalorder %s947_s1, %s568_s6  ;;  %p575_p9 = scmp.lt.u32.totalorder %s568_s6, %s568_s6 }
  0x33   : > { %s956_s27 = scalar_select %p835_p8, 1, 0 }
  0x34   : > { %p571_p12 = pnand %p569_p6, %p540_p5  ;;  %p577_p10 = scmp.lt.u32.totalorder %s568_s6, %s947_s1 }
  0x36   : > { %p572_p0 = pneg %p571_p12  ;;  %p578_p11 = por %p577_p10, %p575_p9 }
  0x38   : > { %p579_p1 = pnand %p578_p11, %p572_p0 }
  0x3a   : > { %582 = shalt.err (!%p579_p1)
}
  0x3b   : > { %s583_s17 = scalar_lea.vmem %s180_s3, 256  ;;  %s590_s22 = scalar_lea.vmem %s180_s3, 512 }
  0x3c   : > { %p584_p3 = scmp.ne.s32.totalorder %s180_s3, %s583_s17  ;;  %p591_p4 = scmp.lt.s32.totalorder %s180_s3, %s180_s3 }
  0x3d   : > { %p592_p8 = scmp.lt.s32.totalorder %s590_s22, %s583_s17 }
  0x3e   : > { %p586_p7 = pnand %p584_p3, %p540_p5 }
  0x3f   : > { %p593_p6 = por %p592_p8, %p591_p4 }
  0x40   : > { %p587_p13 = pneg %p586_p7 }
  0x42   : > { %p594_p12 = pnand %p593_p6, %p587_p13 }
  0x44   : > { %597 = shalt.err (!%p594_p12)
}
  0x45   : > { %452 = dma.hbm_to_vmem [thread:$0]  (!%p804_p2), %s947_s1, 256, %s180_s3, [#allocation6], %s708_s18, %s708_s18, %s709_s20  }
  0x46   : > { %p957_p0 = scmp.ne.s32.totalorder %s956_s27, 0 }
  0x47   : > { %s193_s4 = sand.u32 (!%p957_p0), 1, %s693_s13   ;;  %p958_p5 = scmp.ne.s32.totalorder (!%p957_p0), %s952_s21, 0 }
  0x48   : > { %191 = sbr.rel (%p957_p0) target bundleno = 147 (0x93), region = 28  ;;  %s425_s5 = sshll.u32 (!%p957_p0), %s193_s4, 4 }
  0x49   : > { %s194_s6 = scalar_lea.sflag (!%p957_p0), [#allocation3], %s193_s4  ;;  %s197_s7 = scalar_lea.vmem (!%p957_p0), [#allocation2], %s425_s5 }
  0x4f   : > { %663 = dma.done.wait (%p958_p5), %s194_s6, 256  }
  0x50   : > { %665 = vsyncadd (%p958_p5), %s194_s6, 4294967040  ;;  %s203_s29 = scalar_lea.sflag [#allocation6], %s193_s4  ;;  %s206_s8 = scalar_lea.vmem [#allocation5], %s425_s5 }
  0x51   : > { %667 = dma.done.wait (%p958_p5), %s203_s29, 256  }
  0x52   : > { %669 = vsyncadd (%p958_p5), %s203_s29, 4294967040  ;;  %s229_s18 = sand.u32 1, %s681_s10   ;;  %s438_s20 = sshll.u32 %s697_s14, 4  ;;  %v711_v0 = vmov 0.0   ;;  %v245_v1 = vld [vmem:[%s197_s7] sm:$0xff]  ;;  %v246_v2 = vld [vmem:[%s197_s7 + $0x8] sm:$0xff] }
  0x53   : > { %s427_s27 = sshll.u32 %s229_s18, 3  ;;  %s879_s3 = sadd.s32 16, %s438_s20  ;;  %v247_v3 = vld [vmem:[%s206_s8] sm:$0xff]  ;;  %v248_v4 = vld [vmem:[%s206_s8 + $0x8] sm:$0xff] }
  0x54   : > { %s881_s28 = scalar_lea.vmem [#allocation7], %s427_s27  ;;  %v249_v5 = vsub.f32 %v245_v1, %v247_v3  ;;  %v250_v6 = vsub.f32 %v246_v2, %v248_v4  ;;  %p429_p2 = scmp.le.s32.totalorder %s879_s3, 16 }
  0x55   : > { %244 = vst [vmem:[%s881_s28] sm:$0xff] %v711_v0  ;;  %v277_v21 = vlaneseq (!%p429_p2)  ;;  %v280_v22 = vstv (!%p429_p2), %s438_s20 }
  0x56   : > { %v251_v7 = vmul.f32 %v249_v5, %v249_v5  ;;  %v252_v8 = vmul.f32 %v250_v6, %v250_v6 }
  0x57   : > { %v278_v23 = vshrl.u32 (!%p429_p2), %v277_v21, 7 }
  0x58   : > { %v253_v9 = vadd.f32 1e-06, %v251_v7  ;;  %v254_v10 = vadd.f32 1e-06, %v252_v8 }
  0x59   : > { %v279_v24 = vadd.s32 (!%p429_p2), 8, %v278_v23  ;;  %v281_v25 = vadd.s32 (!%p429_p2), %v280_v22, %v278_v23 }
  0x5a   : > { %534 = vrsqrt.f32 %v253_v9  ;;  %vm257_vm0 = vcmp.eq.f32.partialorder %v253_v9, inf  ;;  %v260_v12 = vand.u32 2147483648, %v253_v9  ;;  %vm259_vm1 = vcmp.eq.f32.partialorder %v253_v9, 0.0 }
  0x5b   : > { %536 = vrsqrt.f32 %v254_v10  ;;  %vm264_vm2 = vcmp.eq.f32.partialorder %v254_v10, inf  ;;  %v267_v15 = vand.u32 2147483648, %v254_v10  ;;  %vm266_vm3 = vcmp.eq.f32.partialorder %v254_v10, 0.0 }
  0x5c   : > { %v282_v26 = vadd.s32 (!%p429_p2), %v280_v22, %v279_v24  ;;  %vm283_vm4 = vcmp.lt.s32.totalorder (!%p429_p2), %v281_v25, 16  ;;  %v287_v29 = vld [vmem:[%s881_s28] sm:$0xff] (!%p429_p2) }
  0x5e   : > { %vm284_vm5 = vcmp.lt.s32.totalorder (!%p429_p2), %v282_v26, 16 }
  0x63   : > { %275 = sbr.rel (%p429_p2) target bundleno = 112 (0x70), region = 44 }
  0x64   : > { %v535_v11 = vpop.eup %534 }
  0x65   : > { %v537_v13 = vpop.eup %536  ;;  %v256_v14 = vmul.f32 %v535_v11, %v253_v9 }
  0x66   : > { %v263_v16 = vmul.f32 %v537_v13, %v254_v10 }
  0x67   : > { %v258_v17 = vsel %vm257_vm0, %v253_v9, %v256_v14 }
  0x68   : > { %v261_v18 = vsel %vm259_vm1, %v260_v12, %v258_v17  ;;  %v265_v19 = vsel %vm264_vm2, %v254_v10, %v263_v16 }
  0x69   : > { %v268_v20 = vsel %vm266_vm3, %v267_v15, %v265_v19  ;;  %v285_v27 = vsel (!%p429_p2), %vm283_vm4, %v261_v18, 0.0 }
  0x6a   : > { %v286_v28 = vsel %vm284_vm5, %v268_v20, 0.0 }
  0x6b   : > { %v288_v30 = vadd.f32 %v286_v28, %v285_v27 }
  0x6d   : > { %v289_v31 = vadd.f32 %v288_v30, %v287_v29 }
  0x6f   : > { %290 = vst [vmem:[%s881_s28] sm:$0xff] %v289_v31 }
  0x70 PF: > { %p431_p8 = scmp.gt.s32.totalorder %s879_s3, 16 }
  0x71   : > { %v296_v33 = vadd.f32 (!%p431_p8), %v268_v20, %v261_v18 }
  0x72   : > { %294 = sbr.rel (%p431_p8) target bundleno = 122 (0x7a), region = 48 }
  0x76   : > { %v295_v32 = vld [vmem:[%s881_s28] sm:$0xff] (!%p431_p8) }
  0x77   : > { %v297_v34 = vadd.f32 (!%p431_p8), %v296_v33, %v295_v32 }
  0x79   : > { %298 = vst [vmem:[%s881_s28] sm:$0xff] %v297_v34 }
  0x7a PF: > { %s433_s21 = sshll.u32 %s697_s14, 7  ;;  %s313_s23 = sshll.u32 %s881_s28, 4  ;;  %s314_s23 = int_to_ptr.vmem [resolvable:$true] %s313_s23 }
  0x7b   : > { %s896_s22 = scalar_lea.hbm %s948_s2, %s433_s21  ;;  %s300_s30 = scalar_lea.sflag [#allocation4], %s229_s18 }
  0x7c   : > { %s598_s4 = scalar_lea.vmem %s314_s23, 128  ;;  %p959_p10 = scmp.ne.s32.totalorder %s953_s25, 0 }
  0x7d   : > { %p599_p9 = scmp.ne.s32.totalorder %s314_s23, %s598_s4  ;;  %s712_s5 = smov [#allocation7]  }
  0x7e   : > { %s602_s6 = sshll.u32 %s712_s5, 4  ;;  %s603_s6 = int_to_ptr.vmem [resolvable:$false] %s602_s6 }
  0x7f   : > { %p600_p11 = pnand %p599_p9, %p959_p10  ;;  %s604_s7 = scalar_lea.vmem %s603_s6, 256 }
  0x80   : > { %p605_p3 = scmp.lt.s32.totalorder %s314_s23, %s603_s6  ;;  %p606_p7 = scmp.lt.s32.totalorder %s604_s7, %s598_s4 }
  0x81   : > { %p601_p1 = pneg %p600_p11 }
  0x82   : > { %p607_p13 = por %p606_p7, %p605_p3 }
  0x84   : > { %p608_p4 = pnand %p607_p13, %p601_p1 }
  0x86   : > { %611 = shalt.err (!%p608_p4)
}
  0x87   : > { %s612_s14 = scalar_lea.hbm %s896_s22, 128  ;;  %s616_s18 = scalar_lea.hbm %s948_s2, 256 }
  0x88   : > { %p613_p6 = scmp.ne.s32.totalorder %s896_s22, %s612_s14  ;;  %p617_p5 = scmp.lt.u32.totalorder %s896_s22, %s948_s2 }
  0x89   : > { %p618_p2 = scmp.lt.u32.totalorder %s616_s18, %s612_s14  ;;  %p620_p9 = scmp.lt.u32.totalorder %s612_s14, %s896_s22 }
  0x8a   : > { %p614_p12 = pnand %p613_p6, %p959_p10 }
  0x8b   : > { %p619_p8 = por %p618_p2, %p617_p5 }
  0x8c   : > { %p615_p0 = pneg %p614_p12 }
  0x8d   : > { %p621_p11 = por %p620_p9, %p619_p8 }
  0x8f   : > { %p622_p1 = pnand %p621_p11, %p615_p0 }
  0x91   : > { %625 = shalt.err (!%p622_p1)
}
  0x92   : > { %444 = dma.vmem_to_hbm [thread:$0]  (%p959_p10), %s314_s23, 128, %s896_s22, %s300_s30  }
  0x93 PF: > { %s325_s3 = sand.u32 1, %s677_s9   ;;  %p960_p3 = scmp.ne.s32.totalorder %s954_s26, 0 }
  0x94   : > { %p961_p7 = scmp.ge.s32.totalorder %s705_s16, 2  ;;  %s326_s28 = scalar_lea.sflag [#allocation4], %s325_s3 }
  0x96   : > { %p454_p13 = pnand %p961_p7, %p960_p3 }
  0x98   : > { %671 = dma.done.wait (!%p454_p13), %s326_s28, 128  }
  0x99   : > { %673 = vsyncadd (!%p454_p13), %s326_s28, 4294967168  ;;  %s21_s16 = sadd.s32 1, %s705_s16   ;;  %s962_s9 = smov %s681_s10 }
  0x9a   : > { %p18_p4 = scmp.ge.s32.totalorder %s21_s16, 4   ;;  %s963_s10 = smov %s685_s11 }
  0x9b   : > { %s964_s11 = smov %s786_s24  ;;  %s965_s12 = smov %s693_s13 }
  0x9c   : > { %s936_s13 = smov 0   ;;  %s966_s14 = smov %s701_s15 }
  0x9d   : > { %s967_s15 = smov %s969_s19  ;;  %20 = sbr.rel (!%p18_p4) target bundleno = 9 (0x9), region = 98 }
  0xa4   :  { %331 = vsyncpa [#allocation3], 1 }
  0xa5   :  { %333 = vsyncpa [#allocation3 + $0x1], 1 }
  0xa6   :  { %334 = vsyncpa [#allocation6], 1 }
  0xa7   :  { %336 = vsyncpa [#allocation6 + $0x1], 1 }
  0xa8   :  { %337 = vsyncpa [#allocation4], 1 }
  0xa9   :  { %339 = vsyncpa [#allocation4 + $0x1], 1 }

</bundles_post_ra>
